<compile_context>
chip_gen: v7x
topology: tpu7x:2x2x1
jax: 0.10.0
libtpu: 0.0.40
codegen_flags: <defaults>
</compile_context>

<pallas_src>
import numpy as np
import jax
import jax.numpy as jnp
from jax import lax
from jax.experimental import pallas as pl
from jax.experimental.pallas import tpu as pltpu

_MIB = 1 << 20


def _round_up(x, m):
    return (x + m - 1) // m * m


def _vmem_capacity_bytes():
    """Generation-aware VMEM capacity (128 MiB on v5e/v6e, 64 MiB on v7x)."""
    try:
        cap = int(pltpu.get_tpu_info().vmem_capacity_bytes)
        if cap > 0:
            return cap
    except Exception:
        pass
    return 64 * _MIB  # conservative default (v7x per-core VMEM)


# ------------------------------ Pallas kernel -------------------------------

def _make_conv_kernel(offsets, c, cp, tile_n):
    """Fused dynamic-conv kernel: one (batch, spatial-tile) grid step per call."""

    def kernel(xm_ref,    # VMEM (1, C, TILE_N)        bf16  main activation tile
               xh_ref,    # VMEM (1, C, HALO)          bf16  halo block
               aggw_ref,  # VMEM (1, OCp, T*Cp)        bf16  per-sample agg. weights
               aggb_ref,  # VMEM (1, OCp, 1)           f32   per-sample agg. bias
               out_ref,   # VMEM (1, OCp, TILE_N)      bf16
               win_ref,   # VMEM scratch (C, TILE_N + HALO)  bf16
               col_ref):  # VMEM scratch (T*Cp, TILE_N)      bf16  im2col block
        # -- stitch main tile + halo into a contiguous window (aligned stores) --
        win_ref[:, :tile_n] = xm_ref[0]
        win_ref[:, tile_n:] = xh_ref[0]

        # -- build the im2col block: tap-shifted copies stacked on the
        #    contraction axis (sublane-aligned stores, static lane offsets) --
        if c < cp:
            pad_rows = jnp.zeros((cp - c, tile_n), jnp.bfloat16)
        for t, off in enumerate(offsets):
            r0 = t * cp
            col_ref[r0:r0 + c, :] = win_ref[:, off:off + tile_n]
            if c < cp:
                col_ref[r0 + c:r0 + cp, :] = pad_rows  # keep pad rows finite/zero

        # -- ONE MXU matmul, contraction depth T*Cp, f32 accumulation --
        acc = jnp.dot(aggw_ref[0], col_ref[...],
                      preferred_element_type=jnp.float32)
        out_ref[0] = (acc + aggb_ref[0]).astype(out_ref.dtype)

    return kernel


# ------------------------------ module wrapper ------------------------------

class DynamicConv2d:
    """JAX/Pallas re-implementation of the PyTorch Dynamic_Conv2d forward."""

    def __init__(self, in_planes, out_planes, kernel_size, stride=1, padding=0,
                 dilation=1, groups=1, bias=True, K=4, tile_n=None, key=None):
        assert in_planes % groups == 0
        assert groups == 1  # TODO(synk): groups > 1 (grouped dynamic conv) not implemented
        self.in_planes, self.out_planes = in_planes, out_planes
        self.kernel_size, self.stride, self.padding = kernel_size, stride, padding
        self.dilation, self.groups, self.K = dilation, groups, K
        self.has_bias = bias
        self.tile_n_request = tile_n

        key = jax.random.PRNGKey(42) if key is None else key
        k1, k2, k3, k4, k5, k6 = jax.random.split(key, 6)
        f32 = jnp.float32
        # Attention2d params (Conv2d(in_planes, K, 1) / Conv2d(K, K, 1))
        self.fc1_w = 0.1 * jax.random.normal(k1, (K, in_planes, 1, 1), f32)
        self.fc1_b = 0.1 * jax.random.normal(k2, (K,), f32)
        self.fc2_w = 0.1 * jax.random.normal(k3, (K, K, 1, 1), f32)
        self.fc2_b = 0.1 * jax.random.normal(k4, (K,), f32)
        # Dynamic conv weight banks (torch layout (K, OC, C, kh, kw)) + bias banks
        self.weight = 0.1 * jax.random.normal(
            k5, (K, out_planes, in_planes // groups, kernel_size, kernel_size), f32)
        self.bias = 0.1 * jax.random.normal(k6, (K, out_planes), f32) if bias else None

        # Padded channel counts (sublane alignment)
        self._cp = _round_up(in_planes, 8)
        self._ocp = _round_up(out_planes, 8)

        # Attention MLP weights in matmul layout
        self._w1t = self.fc1_w.reshape(K, in_planes).T
        self._b1 = self.fc1_b.reshape(1, K)
        self._w2t = self.fc2_w.reshape(K, K).T
        self._b2 = self.fc2_b.reshape(1, K)

        # Generation-aware VMEM budget (queried once, in plain Python)
        self._vmem_capacity = _vmem_capacity_bytes()
        self._vmem_budget = int(0.70 * self._vmem_capacity)

        self._jit_forward = jax.jit(self._forward)

    # --------------------------- VMEM budgeting ---------------------------
    def _vmem_bytes(self, tile_n, halo, C, T):
        Cp, OCp = self._cp, self._ocp
        TCp = T * Cp
        return (2 * C * tile_n * 2          # main activation tile (2x, bf16)
                + 2 * C * halo * 2          # halo block (2x, bf16)
                + 2 * OCp * TCp * 2         # per-sample aggregated weights (2x, bf16)
                + 2 * OCp * 4               # per-sample bias (2x, f32)
                + 2 * OCp * tile_n * 2      # bf16 output tiles (2x)
                + C * (tile_n + halo) * 2   # window scratch (bf16)
                + TCp * tile_n * 2          # im2col scratch (bf16)
                + OCp * tile_n * 4          # f32 matmul accumulator
                + 2 * C * tile_n * 2)       # slack for lane-realignment temporaries

    def _pick_tile_n(self, n_out, halo, C, T):
        """Largest lane-dense spatial tile within the generation-aware budget,
        preferring multiples of 256 (v6e/v7x MXUs are 256 lanes wide)."""
        cap = max(_round_up(n_out, halo), halo)
        if self.tile_n_request is not None:
            return min(_round_up(self.tile_n_request, halo), cap)
        m_max = max(1, min(cap // halo, 256))
        cands = sorted((halo * m for m in range(1, m_max + 1)), reverse=True)
        fitting = [c for c in cands
                   if self._vmem_bytes(c, halo, C, T) <= self._vmem_budget]
        if not fitting:
            return halo
        best = fitting[0]
        for c in fitting:
            if c % 256 == 0:
                return c if 2 * c >= best else best
        return best

    # ------------------------------ forward -------------------------------
    def _forward(self, x):
        B, C, H, W = x.shape
        ks, d, p, s = self.kernel_size, self.dilation, self.padding, self.stride
        OC, OCp, Cp, K = self.out_planes, self._ocp, self._cp, self.K
        T = ks * ks
        TCp = T * Cp

        # ---- Attention2d (tiny, non-tile-aligned -> plain XLA) ----
        pooled = jnp.mean(x, axis=(2, 3))                               # (B, C)
        h = jnp.maximum(pooled @ self._w1t + self._b1, 0.0)
        z = h @ self._w2t + self._b2
        attn = jax.nn.softmax(z, axis=-1)                               # (B, K)

        # ---- per-sample aggregated weights / bias (XLA; negligible FLOPs) ----
        aggw = (attn @ self.weight.reshape(K, -1)).reshape(B, OC, C, ks, ks)
        aggw = jnp.transpose(aggw, (0, 1, 3, 4, 2)).reshape(B, OC, T, C)
        aggw = jnp.pad(aggw, ((0, 0), (0, OCp - OC), (0, 0), (0, Cp - C)))
        aggw = aggw.reshape(B, OCp, TCp).astype(jnp.bfloat16)           # (B,OCp,T*Cp)
        bb = self.bias if self.bias is not None else jnp.zeros((K, OC), jnp.float32)
        aggb = jnp.pad(attn @ bb, ((0, 0), (0, OCp - OC))).reshape(B, OCp, 1)

        # ---- geometry of the flattened (padded-width) stride-1 convolution ----
        Hp, Wp = H + 2 * p, W + 2 * p
        OH1, OW1 = Hp - d * (ks - 1), Wp - d * (ks - 1)
        offsets = [i * d * Wp + j * d for i in range(ks) for j in range(ks)]
        halo = max(128, _round_up(offsets[-1], 128))
        n_out = OH1 * Wp                    # flat output length (padded-width rows)
        tile_n = self._pick_tile_n(n_out, halo, C, T)
        n_pad = _round_up(n_out, tile_n)
        n_tiles = n_pad // tile_n
        flat_len = max(n_pad + halo, Hp * Wp)

        # ---- zero-padded, flattened, bf16 activations ----
        xp = jnp.pad(x, ((0, 0), (0, 0), (p, p), (p, p))).reshape(B, C, Hp * Wp)
        x_flat = jnp.pad(xp, ((0, 0), (0, 0), (0, flat_len - Hp * Wp))
                         ).astype(jnp.bfloat16)

        footprint = self._vmem_bytes(tile_n, halo, C, T)
        vmem_limit = int(min(max(footprint + 16 * _MIB, 32 * _MIB),
                             self._vmem_capacity - 4 * _MIB))
        vmem_limit = int(max(vmem_limit, footprint + 2 * _MIB))

        kernel = _make_conv_kernel(offsets, C, Cp, tile_n)
        r = tile_n // halo                  # halo blocks per main tile
        grid_spec = pltpu.PrefetchScalarGridSpec(
            num_scalar_prefetch=0,
            grid=(B, n_tiles),
            in_specs=[
                pl.BlockSpec((1, C, tile_n), lambda b, n: (b, 0, n)),
                pl.BlockSpec((1, C, halo), lambda b, n: (b, 0, (n + 1) * r)),
                pl.BlockSpec((1, OCp, TCp), lambda b, n: (b, 0, 0)),
                pl.BlockSpec((1, OCp, 1), lambda b, n: (b, 0, 0)),
            ],
            out_specs=pl.BlockSpec((1, OCp, tile_n), lambda b, n: (b, 0, n)),
            scratch_shapes=[pltpu.VMEM((C, tile_n + halo), jnp.bfloat16),
                            pltpu.VMEM((TCp, tile_n), jnp.bfloat16)],
        )
        out_flat = pl.pallas_call(
            kernel,
            grid_spec=grid_spec,
            out_shape=jax.ShapeDtypeStruct((B, OCp, n_pad), jnp.bfloat16),
            compiler_params=pltpu.CompilerParams(
                dimension_semantics=("parallel", "parallel"),
                vmem_limit_bytes=vmem_limit),
        )(x_flat, x_flat, aggw, aggb)

        out = out_flat[:, :OC, :n_out].reshape(B, OC, OH1, Wp)[:, :, :, :OW1]
        out = out.astype(jnp.float32)
        if s > 1:
            # TODO(synk): stride > 1 is computed at stride-1 density then subsampled.
            out = out[:, :, ::s, ::s]
        return out

    def __call__(self, x):
        return self._jit_forward(x)


# ------------------------- pure-JAX reference check -------------------------

def _reference(mod, x):
    B, C, H, W = x.shape
    pooled = x.mean(axis=(2, 3))
    h = jnp.maximum(pooled @ mod.fc1_w.reshape(mod.K, C).T + mod.fc1_b, 0.0)
    z = h @ mod.fc2_w.reshape(mod.K, mod.K).T + mod.fc2_b
    attn = jax.nn.softmax(z, axis=1)
    agg_w = (attn @ mod.weight.reshape(mod.K, -1)).reshape(
        B, mod.out_planes, C, mod.kernel_size, mod.kernel_size)
    agg_b = attn @ mod.bias if mod.bias is not None else jnp.zeros((B, mod.out_planes))
    outs = []
    for b in range(B):
        o = lax.conv_general_dilated(
            x[b:b + 1], agg_w[b],
            window_strides=(mod.stride, mod.stride),
            padding=[(mod.padding, mod.padding)] * 2,
            rhs_dilation=(mod.dilation, mod.dilation),
            dimension_numbers=("NCHW", "OIHW", "NCHW"))
        outs.append(o + agg_b[b][None, :, None, None])
    return jnp.concatenate(outs, axis=0)


if __name__ == "__main__":
    key = jax.random.PRNGKey(0)
    kx, kp1, kp2 = jax.random.split(key, 3)

    B, C_in, C_out, H, W = 2, 4, 8, 16, 16
    x = jax.random.normal(kx, (B, C_in, H, W), jnp.float32)

    # 3x3 dynamic conv with bias (small tile forces the multi-tile + halo path)
    mod3 = DynamicConv2d(C_in, C_out, 3, stride=1, padding=1, bias=True, K=4,
                         tile_n=128, key=kp1)
    out3 = jax.block_until_ready(mod3(x))
    ref3 = _reference(mod3, x)
    assert out3.shape == (B, C_out, H, W), out3.shape
    np.testing.assert_allclose(np.asarray(out3), np.asarray(ref3),
                               rtol=3e-2, atol=3e-2)

    # 1x1 dynamic conv without bias (single-tap / auto-tile path)
    mod1 = DynamicConv2d(C_in, C_out, 1, stride=1, padding=0, bias=False, K=4,
                         key=kp2)
    out1 = jax.block_until_ready(mod1(x))
    ref1 = _reference(mod1, x)
    assert out1.shape == (B, C_out, H, W), out1.shape
    np.testing.assert_allclose(np.asarray(out1), np.asarray(ref1),
                               rtol=3e-2, atol=3e-2)

    print("KERNEL_OK")
</pallas_src>

<mosaic_0001>
module attributes {stable_mosaic.version = 11 : i64} {
  func.func @kernel(%arg0: i32, %arg1: i32, %arg2: memref<1x4x128xbf16, #tpu.memory_space<vmem>>, %arg3: memref<1x4x128xbf16, #tpu.memory_space<vmem>>, %arg4: memref<1x8x72xbf16, #tpu.memory_space<vmem>>, %arg5: memref<1x8x1xf32, #tpu.memory_space<vmem>>, %arg6: memref<1x8x128xbf16, #tpu.memory_space<vmem>>, %arg7: memref<4x256xbf16, #tpu.memory_space<vmem>>, %arg8: memref<72x128xbf16, #tpu.memory_space<vmem>>) attributes {dimension_semantics = [#tpu.dimension_semantics<parallel>, #tpu.dimension_semantics<parallel>], iteration_bounds = array<i64: 2, 3>, scalar_prefetch = 0 : i64, scratch_operands = 2 : i64, tpu.core_type = #tpu.core_type<tc>, window_params = [{transform_indices = @transform_0, window_bounds = array<i64: 1, 4, 128>}, {transform_indices = @transform_1, window_bounds = array<i64: 1, 4, 128>}, {transform_indices = @transform_2, window_bounds = array<i64: 1, 8, 72>}, {transform_indices = @transform_3, window_bounds = array<i64: 1, 8, 1>}, {transform_indices = @transform_4, window_bounds = array<i64: 1, 8, 128>}]} {
    %c0 = arith.constant 0 : index
    %c0_0 = arith.constant 0 : index
    %c0_1 = arith.constant 0 : index
    %0 = vector.load %arg2[%c0, %c0_0, %c0_1] : memref<1x4x128xbf16, #tpu.memory_space<vmem>>, vector<1x4x128xbf16>
    %1 = vector.shape_cast %0 : vector<1x4x128xbf16> to vector<4x128xbf16>
    %c0_2 = arith.constant 0 : index
    %c0_3 = arith.constant 0 : index
    %2 = vector.load %arg7[%c0_2, %c0_3] : memref<4x256xbf16, #tpu.memory_space<vmem>>, vector<4x128xbf16>
    tpu.vector_store %arg7[%c0_2, %c0_3], %1 {strides = array<i32>} : memref<4x256xbf16, #tpu.memory_space<vmem>>, vector<4x128xbf16>,
    %c0_4 = arith.constant 0 : index
    %c0_5 = arith.constant 0 : index
    %c0_6 = arith.constant 0 : index
    %3 = vector.load %arg3[%c0_4, %c0_5, %c0_6] : memref<1x4x128xbf16, #tpu.memory_space<vmem>>, vector<1x4x128xbf16>
    %4 = vector.shape_cast %3 : vector<1x4x128xbf16> to vector<4x128xbf16>
    %c0_7 = arith.constant 0 : index
    %c128 = arith.constant 128 : index
    %5 = vector.load %arg7[%c0_7, %c128] : memref<4x256xbf16, #tpu.memory_space<vmem>>, vector<4x128xbf16>
    tpu.vector_store %arg7[%c0_7, %c128], %4 {strides = array<i32>} : memref<4x256xbf16, #tpu.memory_space<vmem>>, vector<4x128xbf16>,
    %cst = arith.constant 0.000000e+00 : bf16
    %6 = vector.broadcast %cst : bf16 to vector<4x128xbf16>
    %c0_8 = arith.constant 0 : index
    %c0_9 = arith.constant 0 : index
    %7 = vector.load %arg7[%c0_8, %c0_9] : memref<4x256xbf16, #tpu.memory_space<vmem>>, vector<4x128xbf16>
    %c0_10 = arith.constant 0 : index
    %c0_11 = arith.constant 0 : index
    %8 = vector.load %arg8[%c0_10, %c0_11] : memref<72x128xbf16, #tpu.memory_space<vmem>>, vector<4x128xbf16>
    tpu.vector_store %arg8[%c0_10, %c0_11], %7 {strides = array<i32>} : memref<72x128xbf16, #tpu.memory_space<vmem>>, vector<4x128xbf16>,
    %c4 = arith.constant 4 : index
    %c0_12 = arith.constant 0 : index
    %9 = vector.load %arg8[%c4, %c0_12] : memref<72x128xbf16, #tpu.memory_space<vmem>>, vector<4x128xbf16>
    tpu.vector_store %arg8[%c4, %c0_12], %6 {strides = array<i32>} : memref<72x128xbf16, #tpu.memory_space<vmem>>, vector<4x128xbf16>,
    %c0_13 = arith.constant 0 : index
    %c1 = arith.constant 1 : index
    %10 = vector.load %arg7[%c0_13, %c1] : memref<4x256xbf16, #tpu.memory_space<vmem>>, vector<4x128xbf16>
    %c8 = arith.constant 8 : index
    %c0_14 = arith.constant 0 : index
    %11 = vector.load %arg8[%c8, %c0_14] : memref<72x128xbf16, #tpu.memory_space<vmem>>, vector<4x128xbf16>
    tpu.vector_store %arg8[%c8, %c0_14], %10 {strides = array<i32>} : memref<72x128xbf16, #tpu.memory_space<vmem>>, vector<4x128xbf16>,
    %c12 = arith.constant 12 : index
    %c0_15 = arith.constant 0 : index
    %12 = vector.load %arg8[%c12, %c0_15] : memref<72x128xbf16, #tpu.memory_space<vmem>>, vector<4x128xbf16>
    tpu.vector_store %arg8[%c12, %c0_15], %6 {strides = array<i32>} : memref<72x128xbf16, #tpu.memory_space<vmem>>, vector<4x128xbf16>,
    %c0_16 = arith.constant 0 : index
    %c2 = arith.constant 2 : index
    %13 = vector.load %arg7[%c0_16, %c2] : memref<4x256xbf16, #tpu.memory_space<vmem>>, vector<4x128xbf16>
    %c16 = arith.constant 16 : index
    %c0_17 = arith.constant 0 : index
    %14 = vector.load %arg8[%c16, %c0_17] : memref<72x128xbf16, #tpu.memory_space<vmem>>, vector<4x128xbf16>
    tpu.vector_store %arg8[%c16, %c0_17], %13 {strides = array<i32>} : memref<72x128xbf16, #tpu.memory_space<vmem>>, vector<4x128xbf16>,
    %c20 = arith.constant 20 : index
    %c0_18 = arith.constant 0 : index
    %15 = vector.load %arg8[%c20, %c0_18] : memref<72x128xbf16, #tpu.memory_space<vmem>>, vector<4x128xbf16>
    tpu.vector_store %arg8[%c20, %c0_18], %6 {strides = array<i32>} : memref<72x128xbf16, #tpu.memory_space<vmem>>, vector<4x128xbf16>,
    %c0_19 = arith.constant 0 : index
    %c18 = arith.constant 18 : index
    %16 = vector.load %arg7[%c0_19, %c18] : memref<4x256xbf16, #tpu.memory_space<vmem>>, vector<4x128xbf16>
    %c24 = arith.constant 24 : index
    %c0_20 = arith.constant 0 : index
    %17 = vector.load %arg8[%c24, %c0_20] : memref<72x128xbf16, #tpu.memory_space<vmem>>, vector<4x128xbf16>
    tpu.vector_store %arg8[%c24, %c0_20], %16 {strides = array<i32>} : memref<72x128xbf16, #tpu.memory_space<vmem>>, vector<4x128xbf16>,
    %c28 = arith.constant 28 : index
    %c0_21 = arith.constant 0 : index
    %18 = vector.load %arg8[%c28, %c0_21] : memref<72x128xbf16, #tpu.memory_space<vmem>>, vector<4x128xbf16>
    tpu.vector_store %arg8[%c28, %c0_21], %6 {strides = array<i32>} : memref<72x128xbf16, #tpu.memory_space<vmem>>, vector<4x128xbf16>,
    %c0_22 = arith.constant 0 : index
    %c19 = arith.constant 19 : index
    %19 = vector.load %arg7[%c0_22, %c19] : memref<4x256xbf16, #tpu.memory_space<vmem>>, vector<4x128xbf16>
    %c32 = arith.constant 32 : index
    %c0_23 = arith.constant 0 : index
    %20 = vector.load %arg8[%c32, %c0_23] : memref<72x128xbf16, #tpu.memory_space<vmem>>, vector<4x128xbf16>
    tpu.vector_store %arg8[%c32, %c0_23], %19 {strides = array<i32>} : memref<72x128xbf16, #tpu.memory_space<vmem>>, vector<4x128xbf16>,
    %c36 = arith.constant 36 : index
    %c0_24 = arith.constant 0 : index
    %21 = vector.load %arg8[%c36, %c0_24] : memref<72x128xbf16, #tpu.memory_space<vmem>>, vector<4x128xbf16>
    tpu.vector_store %arg8[%c36, %c0_24], %6 {strides = array<i32>} : memref<72x128xbf16, #tpu.memory_space<vmem>>, vector<4x128xbf16>,
    %c0_25 = arith.constant 0 : index
    %c20_26 = arith.constant 20 : index
    %22 = vector.load %arg7[%c0_25, %c20_26] : memref<4x256xbf16, #tpu.memory_space<vmem>>, vector<4x128xbf16>
    %c40 = arith.constant 40 : index
    %c0_27 = arith.constant 0 : index
    %23 = vector.load %arg8[%c40, %c0_27] : memref<72x128xbf16, #tpu.memory_space<vmem>>, vector<4x128xbf16>
    tpu.vector_store %arg8[%c40, %c0_27], %22 {strides = array<i32>} : memref<72x128xbf16, #tpu.memory_space<vmem>>, vector<4x128xbf16>,
    %c44 = arith.constant 44 : index
    %c0_28 = arith.constant 0 : index
    %24 = vector.load %arg8[%c44, %c0_28] : memref<72x128xbf16, #tpu.memory_space<vmem>>, vector<4x128xbf16>
    tpu.vector_store %arg8[%c44, %c0_28], %6 {strides = array<i32>} : memref<72x128xbf16, #tpu.memory_space<vmem>>, vector<4x128xbf16>,
    %c0_29 = arith.constant 0 : index
    %c36_30 = arith.constant 36 : index
    %25 = vector.load %arg7[%c0_29, %c36_30] : memref<4x256xbf16, #tpu.memory_space<vmem>>, vector<4x128xbf16>
    %c48 = arith.constant 48 : index
    %c0_31 = arith.constant 0 : index
    %26 = vector.load %arg8[%c48, %c0_31] : memref<72x128xbf16, #tpu.memory_space<vmem>>, vector<4x128xbf16>
    tpu.vector_store %arg8[%c48, %c0_31], %25 {strides = array<i32>} : memref<72x128xbf16, #tpu.memory_space<vmem>>, vector<4x128xbf16>,
    %c52 = arith.constant 52 : index
    %c0_32 = arith.constant 0 : index
    %27 = vector.load %arg8[%c52, %c0_32] : memref<72x128xbf16, #tpu.memory_space<vmem>>, vector<4x128xbf16>
    tpu.vector_store %arg8[%c52, %c0_32], %6 {strides = array<i32>} : memref<72x128xbf16, #tpu.memory_space<vmem>>, vector<4x128xbf16>,
    %c0_33 = arith.constant 0 : index
    %c37 = arith.constant 37 : index
    %28 = vector.load %arg7[%c0_33, %c37] : memref<4x256xbf16, #tpu.memory_space<vmem>>, vector<4x128xbf16>
    %c56 = arith.constant 56 : index
    %c0_34 = arith.constant 0 : index
    %29 = vector.load %arg8[%c56, %c0_34] : memref<72x128xbf16, #tpu.memory_space<vmem>>, vector<4x128xbf16>
    tpu.vector_store %arg8[%c56, %c0_34], %28 {strides = array<i32>} : memref<72x128xbf16, #tpu.memory_space<vmem>>, vector<4x128xbf16>,
    %c60 = arith.constant 60 : index
    %c0_35 = arith.constant 0 : index
    %30 = vector.load %arg8[%c60, %c0_35] : memref<72x128xbf16, #tpu.memory_space<vmem>>, vector<4x128xbf16>
    tpu.vector_store %arg8[%c60, %c0_35], %6 {strides = array<i32>} : memref<72x128xbf16, #tpu.memory_space<vmem>>, vector<4x128xbf16>,
    %c0_36 = arith.constant 0 : index
    %c38 = arith.constant 38 : index
    %31 = vector.load %arg7[%c0_36, %c38] : memref<4x256xbf16, #tpu.memory_space<vmem>>, vector<4x128xbf16>
    %c64 = arith.constant 64 : index
    %c0_37 = arith.constant 0 : index
    %32 = vector.load %arg8[%c64, %c0_37] : memref<72x128xbf16, #tpu.memory_space<vmem>>, vector<4x128xbf16>
    tpu.vector_store %arg8[%c64, %c0_37], %31 {strides = array<i32>} : memref<72x128xbf16, #tpu.memory_space<vmem>>, vector<4x128xbf16>,
    %c68 = arith.constant 68 : index
    %c0_38 = arith.constant 0 : index
    %33 = vector.load %arg8[%c68, %c0_38] : memref<72x128xbf16, #tpu.memory_space<vmem>>, vector<4x128xbf16>
    tpu.vector_store %arg8[%c68, %c0_38], %6 {strides = array<i32>} : memref<72x128xbf16, #tpu.memory_space<vmem>>, vector<4x128xbf16>,
    %c0_39 = arith.constant 0 : index
    %c0_40 = arith.constant 0 : index
    %c0_41 = arith.constant 0 : index
    %34 = vector.load %arg4[%c0_39, %c0_40, %c0_41] : memref<1x8x72xbf16, #tpu.memory_space<vmem>>, vector<1x8x72xbf16>
    %35 = vector.shape_cast %34 : vector<1x8x72xbf16> to vector<8x72xbf16>
    %c0_42 = arith.constant 0 : index
    %c0_43 = arith.constant 0 : index
    %36 = vector.load %arg8[%c0_42, %c0_43] : memref<72x128xbf16, #tpu.memory_space<vmem>>, vector<72x128xbf16>
    %cst_44 = arith.constant dense<0.000000e+00> : vector<8x128xf32>
    %37 = tpu.matmul %35, %36, %cst_44 {dimension_numbers = #tpu.dot_dimension_numbers<[1], [0], [0], [1], [0, 0, 1, 1], [], []>} : vector<8x72xbf16>, vector<72x128xbf16>, vector<8x128xf32> -> vector<8x128xf32>
    %c0_45 = arith.constant 0 : index
    %c0_46 = arith.constant 0 : index
    %c0_47 = arith.constant 0 : index
    %38 = vector.load %arg5[%c0_45, %c0_46, %c0_47] : memref<1x8x1xf32, #tpu.memory_space<vmem>>, vector<1x8x1xf32>
    %39 = vector.shape_cast %38 : vector<1x8x1xf32> to vector<8x1xf32>
    %40 = vector.broadcast %39 : vector<8x1xf32> to vector<8x128xf32>
    %41 = arith.addf %37, %40 : vector<8x128xf32>
    %42 = arith.truncf %41 : vector<8x128xf32> to vector<8x128xbf16>
    %c0_48 = arith.constant 0 : index
    %c0_49 = arith.constant 0 : index
    %c0_50 = arith.constant 0 : index
    %43 = vector.load %arg6[%c0_48, %c0_49, %c0_50] : memref<1x8x128xbf16, #tpu.memory_space<vmem>>, vector<1x8x128xbf16>
    %44 = vector.shape_cast %43 : vector<1x8x128xbf16> to vector<8x128xbf16>
    %45 = vector.shape_cast %42 : vector<8x128xbf16> to vector<1x8x128xbf16>
    tpu.vector_store %arg6[%c0_48, %c0_49, %c0_50], %45 {strides = array<i32>} : memref<1x8x128xbf16, #tpu.memory_space<vmem>>, vector<1x8x128xbf16>,
    return
  }
  func.func @transform_0(%arg0: i32, %arg1: i32) -> (i32, i32, i32) {
    %c0_i32 = arith.constant 0 : i32
    %c0_i32_0 = arith.constant 0 : i32
    return %arg0, %c0_i32, %arg1 : i32, i32, i32
  }
  func.func @transform_1(%arg0: i32, %arg1: i32) -> (i32, i32, i32) {
    %c1_i32 = arith.constant 1 : i32
    %0 = arith.addi %arg1, %c1_i32 : i32
    %c1_i32_0 = arith.constant 1 : i32
    %1 = arith.muli %0, %c1_i32_0 : i32
    %c0_i32 = arith.constant 0 : i32
    %c0_i32_1 = arith.constant 0 : i32
    return %arg0, %c0_i32, %1 : i32, i32, i32
  }
  func.func @transform_2(%arg0: i32, %arg1: i32) -> (i32, i32, i32) {
    %c0_i32 = arith.constant 0 : i32
    %c0_i32_0 = arith.constant 0 : i32
    %c0_i32_1 = arith.constant 0 : i32
    return %arg0, %c0_i32, %c0_i32_0 : i32, i32, i32
  }
  func.func @transform_3(%arg0: i32, %arg1: i32) -> (i32, i32, i32) {
    %c0_i32 = arith.constant 0 : i32
    %c0_i32_0 = arith.constant 0 : i32
    %c0_i32_1 = arith.constant 0 : i32
    return %arg0, %c0_i32, %c0_i32_0 : i32, i32, i32
  }
  func.func @transform_4(%arg0: i32, %arg1: i32) -> (i32, i32, i32) {
    %c0_i32 = arith.constant 0 : i32
    %c0_i32_0 = arith.constant 0 : i32
    return %arg0, %c0_i32, %arg1 : i32, i32, i32
  }
}

</mosaic_0001>

<bundles_post_ra>
// kernel: _forward.1
= control target key start
LH: loop header
LB: loop body
LE: loop exit
PB: predicated region body
PF: predicated region fallthrough
CT: control target
= control target key end

     0   :  { %s848_s15 = smov 0   ;;  %s850_s16 = smov 0   ;;  %s931_s0 = inlined_call_operand.vmem [shape: bf16[2,4,512], index: 0, kind: input, shape index: {}, may-alias: {0,1}]   ;;  %s932_s1 = inlined_call_operand.vmem [shape: bf16[2,4,512], index: 1, kind: input, shape index: {}, may-alias: {0,1}]   ;;  %s933_s2 = inlined_call_operand.vmem [shape: bf16[2,8,72], index: 2, kind: input, shape index: {}]   ;;  %s934_s3 = inlined_call_operand.vmem [shape: f32[2,8,1], index: 3, kind: input, shape index: {}]   ;;  %s935_s4 = inlined_call_operand.vmem [shape: bf16[2,8,384], index: 4, kind: output, shape index: {}]  }
   0x1   :  { %s852_s17 = smov 0   ;;  %s854_s18 = smov 0  }
   0x2   :  { %s856_s19 = smov 0  }
   0x3 LB: > { %s23_s20 = sadd.s32 1, %s802_s17  ;;  %s26_s21 = sadd.s32 1, %s806_s18  ;;  %s810_s19 = sphi %s856_s19, %s14_s19   ;;  %s806_s18 = sphi %s854_s18, %s939_s18   ;;  %s802_s17 = sphi %s852_s17, %s938_s17   ;;  %s798_s16 = sphi %s850_s16, %s937_s16   ;;  %s794_s15 = sphi %s848_s15, %s936_s15  }
   0x4   : > { %p24_p0 = scmp.ge.s32.totalorder %s23_s20, 3  ;;  %p670_p1 = scmp.ge.s32.totalorder %s810_s19, 1 }
   0x5   : > { %p218_p2 = scmp.lt.s32.totalorder %s810_s19, 7 }
   0x6   : > { %s941_s20 = smov (%p24_p0, %s23_s20), 0  ;;  %s943_s21 = smov (!%p24_p0, %s26_s21), %s806_s18 }
   0x7   : > { %p219_p3 = pnand %p670_p1, %p218_p2  ;;  %p28_p4 = scmp.ge.s32.totalorder %s943_s21, 2 }
   0x8   : > { %p267_p5 = scmp.lt.s32.totalorder (!%p219_p3), %s798_s16, 1  ;;  %p269_p6 = scmp.lt.s32.totalorder (!%p219_p3), %s794_s15, 3  ;;  %v812_v1 = vmov (!%p219_p3), 0   ;;  %v813_v4 = vmov (!%p219_p3), 0.0   ;;  %vm822_vm0 = vmmov (!%p219_p3), 0   ;;  %vm321_vm1 = vcmask (!%p219_p3), 1039360  }
   0x9   : > { %s945_s21 = smov (%p28_p4, %s943_s21), 0  ;;  %222 = sbr.rel (%p219_p3) target bundleno = 394 (0x18a), region = 36 }
   0xa   : > { %s275_s22 = sadd.s32 (!%p219_p3), 1, %s794_s15  ;;  %308 = vst [vmem:[#allocation3] sm:$0xc] (!%p219_p3), %v812_v1  ;;  %325 = vst [vmem:[#allocation3 + $0x4] sm:$0xc] (!%p219_p3), %v812_v1  ;;  %766 = vset.pattern.permute.xlu0 (!%p219_p3), %v812_v1  ;;  %700 = vmatprep.subr.bf16.mxu0 (!%p219_p3), %v813_v4  ;;  %s814_s9 = smov (!%p219_p3), 127  }
   0xb   : > { %p278_p7 = scmp.lt.s32.totalorder (!%p219_p3), %s275_s22, 3  ;;  %342 = vst [vmem:[#allocation3 + $0x8] sm:$0xc] (!%p219_p3), %v812_v1  ;;  %359 = vst [vmem:[#allocation3 + $0xc] sm:$0xc] (!%p219_p3), %v812_v1  ;;  %s815_s10 = smov (!%p219_p3), 110   ;;  %710 = vmatprep.mubr.msk.bf16.mxu0 (!%p219_p3), %vm822_vm0, %v813_v4 }
   0xc   : > { %376 = vst [vmem:[#allocation3 + $0x10] sm:$0xc] (!%p219_p3), %v812_v1  ;;  %393 = vst [vmem:[#allocation3 + $0x14] sm:$0xc] (!%p219_p3), %v812_v1  ;;  %s816_s11 = smov (!%p219_p3), 126   ;;  %s817_s12 = smov (!%p219_p3), 109  }
   0xd   : > { %410 = vst [vmem:[#allocation3 + $0x18] sm:$0xc] (!%p219_p3), %v812_v1  ;;  %427 = vst [vmem:[#allocation3 + $0x1c] sm:$0xc] (!%p219_p3), %v812_v1  ;;  %s818_s13 = smov (!%p219_p3), 108   ;;  %s819_s14 = smov (!%p219_p3), 92  }
   0xe   : > { %vm355_vm2 = vcmask (!%p219_p3), 900096   ;;  %vm338_vm3 = vcmask (!%p219_p3), 1031168   ;;  %vm372_vm4 = vcmask (!%p219_p3), 891904   ;;  %vm389_vm5 = vcmask (!%p219_p3), 883712   ;;  %p295_p8 = scmp.lt.s32.totalorder (!%p219_p3), %s794_s15, 2 }
   0xf   : > { %vm406_vm6 = vcmask (!%p219_p3), 752640   ;;  %vm423_vm7 = vcmask (!%p219_p3), 744448   ;;  %vm440_vm8 = vcmask (!%p219_p3), 736256   ;;  %vm492_vm9 = vcmask (!%p219_p3), 1043456  }
  0x10   : > { %s947_s16 = smov (!%p267_p5, %s798_s16), 1  ;;  %s949_s22 = smov (!%p278_p7, %s275_s22), 3  ;;  %vm488_vm10 = vcmask 588800  }
  0x11   : > { %s270_s23 = scalar_select %p269_p6, %s794_s15, 3 }
  0x12   : > { %s886_s24 = sshll.u32 %s947_s16, 2  ;;  %s714_s6 = smul.u32 3, %s947_s16 }
  0x13   : > { %s272_s25 = sadd.s32 %s886_s24, %s270_s23  ;;  %s281_s30 = sadd.s32 %s886_s24, %s949_s22 }
  0x14   : > { %s672_s26 = sshll.u32 %s272_s25, 1  ;;  %s674_s5 = sshll.u32 %s281_s30, 1 }
  0x15   : > { %s274_s29 = scalar_lea.vmem %s931_s0, %s672_s26  ;;  %s283_s8 = scalar_lea.vmem %s932_s1, %s674_s5 }
  0x16   : > { %v302_v0 = vld [vmem:[%s274_s29] sm:$0x3]  ;;  %s820_s22 = smov 91   ;;  %s821_s23 = smov 90  }
  0x17   : > { %303 = vst [vmem:[#allocation2] sm:$0x3] %v302_v0  ;;  %v304_v2 = vld [vmem:[%s283_s8] sm:$0x3]  ;;  %s676_s25 = sshll.u32 %s947_s16, 3  ;;  %s288_s5 = scalar_lea.vmem %s933_s2, %s886_s24 }
  0x18   : > { %305 = vst [vmem:[#allocation2 + $0x2] sm:$0x3] %v304_v2  ;;  %s292_s28 = scalar_lea.vmem %s934_s3, %s676_s25  ;;  %v445_v37 = vld [vmem:[%s288_s5] sm:$0xf]  ;;  %s951_s15 = smov (!%p295_p8, %s794_s15), 2 }
  0x19   : > { %v455_v6 = vld [vmem:[%s292_s28] sm:$0xff]  ;;  %s298_s7 = sadd.s32 %s714_s6, %s951_s15 }
  0x1a   : > { %s677_s8 = sshll.u32 %s298_s7, 2 }
  0x1e   : > { %v306_v3 = vld [vmem:[#allocation2] sm:$0x3] }
  0x1f   : > { %307 = vst [vmem:[#allocation3] sm:$0x3] %v306_v3  ;;  %v678_v5 = vld.sshfl [vmem:[#allocation2] sm:$0x33 pattern:$0x76325410] }
  0x20   : > { %318 = vrot.lane.b32.xlu0 %v678_v5, %s814_s9  ;;  %352 = vrot.lane.b32.xlu1 %v678_v5, %s815_s10 }
  0x24   : > { %335 = vrot.lane.b32.xlu0 %v678_v5, %s816_s11  ;;  %369 = vrot.lane.b32.xlu1 %v678_v5, %s817_s12  ;;  %s300_s11 = scalar_lea.vmem %s935_s4, %s677_s8 }
  0x28   : > { %386 = vrot.lane.b32.xlu0 %v678_v5, %s818_s13  ;;  %403 = vrot.lane.b32.xlu1 %v678_v5, %s819_s14 }
  0x2c   : > { %420 = vrot.lane.b32.xlu0 %v678_v5, %s820_s22  ;;  %437 = vrot.lane.b32.xlu1 %v678_v5, %s821_s23 }
  0x30   : > { %458 = vperm.xlu0 %766, %v455_v6  }
  0x92   : > { %v319_v7 = vpop.permute.xlu0 %318  ;;  %v353_v8 = vpop.permute.xlu1 %352 }
  0x93   : > { %v320_v9 = vrot.slane %v319_v7, 4  ;;  %v354_v10 = vrot.slane %v353_v8, 4 }
  0x95   : > { %v322_v11 = vsel %vm321_vm1, %v319_v7, %v320_v9  ;;  %v356_v12 = vsel %vm355_vm2, %v353_v8, %v354_v10 }
  0x96   : > { %324 = vst [vmem:[#allocation3 + $0x4] sm:$0x3] %v322_v11  ;;  %358 = vst [vmem:[#allocation3 + $0xc] sm:$0x3] %v356_v12  ;;  %v336_v13 = vpop.permute.xlu0 %335  ;;  %v370_v14 = vpop.permute.xlu1 %369 }
  0x97   : > { %v337_v15 = vrot.slane %v336_v13, 4  ;;  %v371_v16 = vrot.slane %v370_v14, 4 }
  0x99   : > { %v339_v17 = vsel %vm338_vm3, %v336_v13, %v337_v15  ;;  %v373_v18 = vsel %vm372_vm4, %v370_v14, %v371_v16 }
  0x9a   : > { %341 = vst [vmem:[#allocation3 + $0x8] sm:$0x3] %v339_v17  ;;  %375 = vst [vmem:[#allocation3 + $0x10] sm:$0x3] %v373_v18  ;;  %v387_v19 = vpop.permute.xlu0 %386  ;;  %v404_v20 = vpop.permute.xlu1 %403 }
  0x9b   : > { %v388_v21 = vrot.slane %v387_v19, 4  ;;  %v405_v22 = vrot.slane %v404_v20, 4 }
  0x9d   : > { %v390_v23 = vsel %vm389_vm5, %v387_v19, %v388_v21  ;;  %v407_v24 = vsel %vm406_vm6, %v404_v20, %v405_v22  ;;  %v767_v25 = vld [vmem:[#allocation3] sm:$0xff]  }
  0x9e   : > { %392 = vst [vmem:[#allocation3 + $0x14] sm:$0x3] %v390_v23  ;;  %409 = vst [vmem:[#allocation3 + $0x18] sm:$0x3] %v407_v24  ;;  %v421_v26 = vpop.permute.xlu0 %420  ;;  %v438_v27 = vpop.permute.xlu1 %437  ;;  %701 = vmatpush3.bf16.msra.mxu0 %v767_v25 }
  0x9f   : > { %v422_v28 = vrot.slane %v421_v26, 4  ;;  %v439_v29 = vrot.slane %v438_v27, 4  ;;  %702 = vmatprep.subr.bf16.mxu0 %v813_v4 }
  0xa1   : > { %v424_v30 = vsel %vm423_vm7, %v421_v26, %v422_v28  ;;  %v441_v31 = vsel %vm440_vm8, %v438_v27, %v439_v29  ;;  %v768_v32 = vld [vmem:[#allocation3 + $0x8] sm:$0xff]  }
  0xa2   : > { %426 = vst [vmem:[#allocation3 + $0x1c] sm:$0x3] %v424_v30  ;;  %443 = vst [vmem:[#allocation3 + $0x20] sm:$0x3] %v441_v31  ;;  %703 = vmatpush3.bf16.msra.mxu0 %v768_v32 }
  0xa3   : > { %704 = vmatprep.subr.bf16.mxu0 %v813_v4 }
  0xa5   : > { %v769_v33 = vld [vmem:[#allocation3 + $0x10] sm:$0xff]  }
  0xa6   : > { %705 = vmatpush3.bf16.msra.mxu0 %v769_v33 }
  0xa7   : > { %706 = vmatprep.subr.bf16.mxu0 %v813_v4 }
  0xa9   : > { %v770_v34 = vld [vmem:[#allocation3 + $0x18] sm:$0xff]   ;;  %v771_v35 = vld [vmem:[#allocation3 + $0x20] ss:$0 sps:$4 sm:$0xff]  }
  0xaa   : > { %707 = vmatpush3.bf16.msra.mxu0 %v770_v34  ;;  %v494_v36 = vsel %vm492_vm9, %v771_v35, 0 }
  0xab   : > { %708 = vmatprep.subr.bf16.mxu0 %v813_v4 }
  0xae   : > { %709 = vmatpush3.bf16.msra.mxu0 %v494_v36 }
  0xaf   : > { %v459_v38 = vpop.permute.xlu0 %458 }
  0xb1   : > { %711 = vmatmul.mubr.msk.bf16.vlgmr.msra.gmra.mrb[0].mxu0 %vm488_vm10, %v445_v37 }
 0x184   : > { %v530_v39 = vpop.f32.mrb[0].mxu0 }
 0x185   : > { %v531_v40 = vadd.f32 %v530_v39, %v459_v38  ;;  %v712_v41 = vpop.f32.mrb[1].mxu0 }
 0x186   : > { %v533_v42 = vpop.f32.mrb[2].mxu0 }
 0x187   : > { %v536_v43 = vpack.c.bf16 %v531_v40, %v531_v40  ;;  %v713_v44 = vpop.f32.mrb[3].mxu0 }
 0x189   : > { %537 = vst [vmem:[%s300_s11] sm:$0xf] %v536_v43 }
 0x18a PF: > { %s14_s19 = sadd.s32 1, %s810_s19   ;;  %s936_s15 = smov %s802_s17 }
 0x18b   : > { %p11_p9 = scmp.ge.s32.totalorder %s14_s19, 8   ;;  %s937_s16 = smov %s806_s18 }
 0x18c   : > { %s938_s17 = smov %s941_s20  ;;  %s939_s18 = smov %s945_s21 }
 0x18d   :  { %13 = sbr.rel (!%p11_p9) target bundleno = 3 (0x3), region = 75 }

</bundles_post_ra>
